<compile_context>
chip_gen: v7x
topology: tpu7x:2x2x1
jax: 0.10.0
libtpu: 0.0.40
codegen_flags: <defaults>
</compile_context>

<pallas_src>
import jax
import jax.numpy as jnp
from jax.experimental import pallas as pl
from jax.experimental.pallas import tpu as pltpu

_LANE = 128
_SUBLANE = 8
_MAX_TILE_ROWS = 1024  # 1024 * 128 = 131072 elems = 512 KiB per f32 tile


def _noise_kernel(sa_ref, sb_ref, x_ref, n_ref, o_ref):
    # sa_ref / sb_ref: SMEM vectors [B] holding sqrt(a) and sqrt(1-a)
    # x_ref / n_ref / o_ref: VMEM tiles [1, tile_rows, 128]
    b = pl.program_id(0)
    sa = sa_ref[b].astype(x_ref.dtype)
    sb = sb_ref[b].astype(x_ref.dtype)
    o_ref[...] = x_ref[...] * sa + n_ref[...] * sb


def noise_forward(x, t, noise=None, *, key=None):
    """Pallas equivalent of Noise.forward(x, t, noise).

    x:     [B, C, H, W] (4-D) or [B, S, D] (3-D), float
    t:     [B], float
    noise: same shape as x; if None, sampled ~ N(0, 1) (torch.randn_like).
    """
    if x.ndim not in (3, 4):
        raise ValueError("Noise expects a 3-D or 4-D input")

    if noise is None:
        # torch.randn_like(x) equivalent (generated on the wrapper side).
        if key is None:
            key = jax.random.PRNGKey(0)
        noise = jax.random.normal(key, x.shape, dtype=x.dtype)

    orig_shape = x.shape
    B = x.shape[0]
    N = 1
    for d in x.shape[1:]:
        N *= int(d)

    # ---- choose a bounded, lane-dense tiling ---------------------------------
    n_rows_raw = (N + _LANE - 1) // _LANE
    if n_rows_raw <= _MAX_TILE_ROWS:
        tile_rows = max(_SUBLANE, ((n_rows_raw + _SUBLANE - 1) // _SUBLANE) * _SUBLANE)
    else:
        tile_rows = _MAX_TILE_ROWS
    n_rows = ((n_rows_raw + tile_rows - 1) // tile_rows) * tile_rows
    n_pad = n_rows * _LANE

    x2 = x.reshape(B, N)
    nz2 = noise.reshape(B, N)
    if n_pad != N:
        pad = ((0, 0), (0, n_pad - N))
        x2 = jnp.pad(x2, pad)
        nz2 = jnp.pad(nz2, pad)
    x3 = x2.reshape(B, n_rows, _LANE)
    nz3 = nz2.reshape(B, n_rows, _LANE)

    # ---- per-batch scalars (hoisted out of the kernel) -----------------------
    a = jnp.cos(t.astype(jnp.float32) * (jnp.pi * 0.5)) ** 2
    sa = jnp.sqrt(a)        # sqrt(cosine_schedule(t))
    sb = jnp.sqrt(1.0 - a)  # sqrt(1 - cosine_schedule(t))

    grid = (B, n_rows // tile_rows)
    itemsize = jnp.dtype(x.dtype).itemsize

    tile_spec = pl.BlockSpec((1, tile_rows, _LANE), lambda b, n: (b, n, 0))

    out3 = pl.pallas_call(
        _noise_kernel,
        out_shape=jax.ShapeDtypeStruct((B, n_rows, _LANE), x.dtype),
        grid_spec=pltpu.PrefetchScalarGridSpec(
            num_scalar_prefetch=0,
            grid=grid,
            in_specs=[
                pl.BlockSpec(memory_space=pltpu.MemorySpace.SMEM),  # sa
                pl.BlockSpec(memory_space=pltpu.MemorySpace.SMEM),  # sb
                tile_spec,                                          # x
                tile_spec,                                          # noise
            ],
            out_specs=tile_spec,
        ),
        compiler_params=pltpu.CompilerParams(
            dimension_semantics=("parallel", "parallel"),
            vmem_limit_bytes=32 * 1024 * 1024,
        ),
        cost_estimate=pl.CostEstimate(
            flops=3 * B * n_pad,
            transcendentals=0,
            bytes_accessed=3 * B * n_pad * itemsize,
        ),
    )(sa, sb, x3, nz3)

    out2 = out3.reshape(B, n_pad)
    if n_pad != N:
        out2 = out2[:, :N]
    return out2.reshape(orig_shape)


def _reference(x, t, noise):
    # pure-JAX reference for correctness check (matches PyTorch Noise.forward)
    a = jnp.cos(t.astype(jnp.float32) * jnp.pi * 0.5) ** 2
    extra = (1,) * (x.ndim - 1)
    a = a.reshape((-1,) + extra)
    return jnp.sqrt(a) * x + jnp.sqrt(1.0 - a) * noise


if __name__ == "__main__":
    key = jax.random.PRNGKey(0)
    k1, k2, k3, k4, k5 = jax.random.split(key, 5)

    # 4-D case: NCHW, batch=2, channels=4, spatial=16x16
    B, C, H, W = 2, 4, 16, 16
    x4 = jax.random.normal(k1, (B, C, H, W), dtype=jnp.float32)
    t = jax.random.uniform(k2, (B,), dtype=jnp.float32)  # diffusion times in [0, 1)
    n4 = jax.random.normal(k3, (B, C, H, W), dtype=jnp.float32)

    out4 = noise_forward(x4, t, n4)
    jax.block_until_ready(out4)
    ref4 = _reference(x4, t, n4)
    assert jnp.allclose(out4, ref4, atol=1e-5, rtol=1e-5), "4-D mismatch"

    # 3-D case: batch=2, seq=8, hidden=32 (exercises the padding path)
    x3 = jax.random.normal(k4, (B, 8, 32), dtype=jnp.float32)
    n3 = jax.random.normal(k5, (B, 8, 32), dtype=jnp.float32)
    out3 = noise_forward(x3, t, n3)
    jax.block_until_ready(out3)
    ref3 = _reference(x3, t, n3)
    assert jnp.allclose(out3, ref3, atol=1e-5, rtol=1e-5), "3-D mismatch"

    # default-noise path (noise=None -> randn_like generated from `key`)
    out_def = noise_forward(x4, t, key=k5)
    jax.block_until_ready(out_def)
    ref_def = _reference(x4, t, jax.random.normal(k5, x4.shape, dtype=x4.dtype))
    assert jnp.allclose(out_def, ref_def, atol=1e-5, rtol=1e-5), "default-noise mismatch"

    print("KERNEL_OK")
</pallas_src>

<mosaic_0001>
module attributes {stable_mosaic.version = 11 : i64} {
  func.func @_noise_kernel(%arg0: i32, %arg1: i32, %arg2: memref<2xf32, #tpu.memory_space<smem>>, %arg3: memref<2xf32, #tpu.memory_space<smem>>, %arg4: memref<1x8x128xf32, #tpu.memory_space<vmem>>, %arg5: memref<1x8x128xf32, #tpu.memory_space<vmem>>, %arg6: memref<1x8x128xf32, #tpu.memory_space<vmem>>) attributes {dimension_semantics = [#tpu.dimension_semantics<parallel>, #tpu.dimension_semantics<parallel>], iteration_bounds = array<i64: 2, 1>, scalar_prefetch = 0 : i64, scratch_operands = 0 : i64, tpu.core_type = #tpu.core_type<tc>, window_params = [{transform_indices = @transform_0, window_bounds = array<i64: 2>}, {transform_indices = @transform_1, window_bounds = array<i64: 2>}, {transform_indices = @transform_2, window_bounds = array<i64: 1, 8, 128>}, {transform_indices = @transform_3, window_bounds = array<i64: 1, 8, 128>}, {transform_indices = @transform_4, window_bounds = array<i64: 1, 8, 128>}]} {
    %0 = arith.index_cast %arg0 : i32 to index
    %1 = memref.load %arg2[%0] : memref<2xf32, #tpu.memory_space<smem>>
    %2 = arith.index_cast %arg0 : i32 to index
    %3 = memref.load %arg3[%2] : memref<2xf32, #tpu.memory_space<smem>>
    %c0 = arith.constant 0 : index
    %c0_0 = arith.constant 0 : index
    %c0_1 = arith.constant 0 : index
    %4 = vector.load %arg4[%c0, %c0_0, %c0_1] : memref<1x8x128xf32, #tpu.memory_space<vmem>>, vector<1x8x128xf32>
    %5 = vector.broadcast %1 : f32 to vector<1x8x128xf32>
    %6 = arith.mulf %4, %5 : vector<1x8x128xf32>
    %c0_2 = arith.constant 0 : index
    %c0_3 = arith.constant 0 : index
    %c0_4 = arith.constant 0 : index
    %7 = vector.load %arg5[%c0_2, %c0_3, %c0_4] : memref<1x8x128xf32, #tpu.memory_space<vmem>>, vector<1x8x128xf32>
    %8 = vector.broadcast %3 : f32 to vector<1x8x128xf32>
    %9 = arith.mulf %7, %8 : vector<1x8x128xf32>
    %10 = arith.addf %6, %9 : vector<1x8x128xf32>
    %c0_5 = arith.constant 0 : index
    %c0_6 = arith.constant 0 : index
    %c0_7 = arith.constant 0 : index
    %11 = vector.load %arg6[%c0_5, %c0_6, %c0_7] : memref<1x8x128xf32, #tpu.memory_space<vmem>>, vector<1x8x128xf32>
    tpu.vector_store %arg6[%c0_5, %c0_6, %c0_7], %10 {strides = array<i32>} : memref<1x8x128xf32, #tpu.memory_space<vmem>>, vector<1x8x128xf32>,
    return
  }
  func.func @transform_0(%arg0: i32, %arg1: i32) -> i32 {
    %c0_i32 = arith.constant 0 : i32
    %c0_i32_0 = arith.constant 0 : i32
    return %c0_i32 : i32
  }
  func.func @transform_1(%arg0: i32, %arg1: i32) -> i32 {
    %c0_i32 = arith.constant 0 : i32
    %c0_i32_0 = arith.constant 0 : i32
    return %c0_i32 : i32
  }
  func.func @transform_2(%arg0: i32, %arg1: i32) -> (i32, i32, i32) {
    %c0_i32 = arith.constant 0 : i32
    %c0_i32_0 = arith.constant 0 : i32
    return %arg0, %arg1, %c0_i32 : i32, i32, i32
  }
  func.func @transform_3(%arg0: i32, %arg1: i32) -> (i32, i32, i32) {
    %c0_i32 = arith.constant 0 : i32
    %c0_i32_0 = arith.constant 0 : i32
    return %arg0, %arg1, %c0_i32 : i32, i32, i32
  }
  func.func @transform_4(%arg0: i32, %arg1: i32) -> (i32, i32, i32) {
    %c0_i32 = arith.constant 0 : i32
    %c0_i32_0 = arith.constant 0 : i32
    return %arg0, %arg1, %c0_i32 : i32, i32, i32
  }
}

</mosaic_0001>

<bundles_post_ra>
// kernel: tpu_custom_call.1
= control target key start
LH: loop header
LB: loop body
LE: loop exit
PB: predicated region body
PF: predicated region fallthrough
CT: control target
= control target key end

     0   :  { %s1037_s0 = inlined_call_operand.hbm [shape: f32[2], index: 0, kind: input, shape index: {}]   ;;  %s1038_s1 = inlined_call_operand.vmem [shape: f32[2], index: 1, kind: input, shape index: {}]   ;;  %s1039_s2 = inlined_call_operand.hbm [shape: f32[2,8,128], index: 2, kind: input, shape index: {}]   ;;  %s1040_s3 = inlined_call_operand.hbm [shape: f32[2,8,128], index: 3, kind: input, shape index: {}]   ;;  %s1041_s4 = inlined_call_operand.hbm [shape: f32[2,8,128], index: 4, kind: output, shape index: {}]  }
   0x1   :  { %1048 = sst [smem:[#allocation17_spill]] %s1037_s0 }
   0x2   :  { %9 = vsyncpa [#allocation5], 0 }
   0x3   :  { %10 = vsyncpa [#allocation6], 0 }
   0x4   :  { %11 = vsyncpa [#allocation3], 0 }
   0x5   :  { %13 = vsyncpa [#allocation3 + $0x1], 0 }
   0x6   :  { %14 = vsyncpa [#allocation10], 0 }
   0x7   :  { %16 = vsyncpa [#allocation10 + $0x1], 0 }
   0x8   :  { %17 = vsyncpa [#allocation4], 0 }
   0x9   :  { %19 = vsyncpa [#allocation4 + $0x1], 0  ;;  %s770_s15 = smov 0   ;;  %s772_s16 = smov 0  }
   0xa   :  { %s774_s17 = smov 0   ;;  %s776_s18 = smov 0  }
   0xb   :  { %s778_s19 = smov 0   ;;  %s780_s20 = smov 0  }
   0xc LB: > { %s448_s21 = sadd.s32 4294967295, %s738_s20   ;;  %s449_s22 = sadd.s32 4294967294, %s738_s20   ;;  %s738_s20 = sphi %s780_s20, %s25_s20   ;;  %s734_s19 = sphi %s778_s19, %s1070_s19   ;;  %s730_s18 = sphi %s776_s18, %s1069_s18   ;;  %s726_s17 = sphi %s774_s17, %s1068_s17   ;;  %s722_s16 = sphi %s772_s16, %s1067_s16   ;;  %s718_s15 = sphi %s770_s15, %s1066_s15  }
   0xd   : > { %p101_p0 = scmp.ne.s32.totalorder %s722_s16, %s718_s15  ;;  %p804_p1 = scmp.eq.s32.totalorder %s448_s21, 0 }
   0xe   : > { %p808_p2 = scmp.eq.s32.totalorder %s448_s21, 1  ;;  %p161_p3 = scmp.eq.s32.totalorder %s449_s22, 1 }
   0xf   : > { %s1049_s23 = scalar_select %p804_p1, 1, 0 }
  0x10   : > { %p814_p4 = por %p804_p1, %p101_p0  ;;  %p450_p5 = scmp.ge.s32.totalorder %s738_s20, 1 }
  0x11   : > { %p819_p6 = por %p161_p3, %p101_p0  ;;  %p168_p7 = scmp.lt.s32.totalorder %s738_s20, 3 }
  0x12   : > { %s1051_s25 = scalar_select %p814_p4, 1, 0 }
  0x13   : > { %s1052_s26 = scalar_select %p819_p6, 1, 0 }
  0x14   : > { %p824_p8 = pnand %p450_p5, %p168_p7  ;;  %s190_s30 = sshll.u32 %s1038_s1, 4  ;;  %s191_s30 = int_to_ptr.vmem [resolvable:$true] %s190_s30 }
  0x15   : > { %s37_s6 = sadd.s32 1, %s734_s19  ;;  %s1056_s0 = sld [smem:[#allocation17_spill]] }
  0x16   : > { %s1053_s27 = scalar_select %p824_p8, 1, 0 }
  0x17   : > { %p482_p10 = pneg %p824_p8  ;;  %p841_p12 = scmp.ge.s32.totalorder %s37_s6, 2 }
  0x19   : > { %p836_p11 = pnand %p482_p10, %p804_p1 }
  0x1b   : > { %s556_s10 = scalar_lea.hbm %s1056_s0, 16  ;;  %p558_p0 = pneg %p836_p11 }
  0x1c   : > { %p557_p13 = scmp.ne.s32.totalorder %s1056_s0, %s556_s10  ;;  %p563_p7 = scmp.lt.u32.totalorder %s556_s10, %s1056_s0 }
  0x1e   : > { %p559_p3 = pnand %p558_p0, %p557_p13 }
  0x20   : > { %p560_p5 = pneg %p559_p3 }
  0x22   : > { %p565_p10 = pnand %p563_p7, %p560_p5 }
  0x24   : > { %568 = shalt.err (!%p565_p10)
}
  0x25   : > { %s740_s21 = smov [#allocation2]   ;;  %s569_s29 = scalar_lea.vmem %s191_s30, 16 }
  0x26   : > { %485 = dma.hbm_to_smem (!%p836_p11), %s1056_s0, 16, %s740_s21, [#allocation5]  }
  0x27   : > { %p570_p9 = scmp.ne.s32.totalorder %s191_s30, %s569_s29  ;;  %p577_p1 = scmp.lt.s32.totalorder %s191_s30, %s191_s30 }
  0x28   : > { %p578_p13 = scmp.lt.s32.totalorder %s569_s29, %s569_s29 }
  0x29   : > { %p572_p6 = pnand %p570_p9, %p558_p0 }
  0x2a   : > { %p579_p3 = por %p578_p13, %p577_p1 }
  0x2b   : > { %p573_p4 = pneg %p572_p6 }
  0x2d   : > { %p580_p8 = pnand %p579_p3, %p573_p4 }
  0x2f   : > { %583 = shalt.err (!%p580_p8)
}
  0x30   : > { %s741_s8 = smov [#allocation7]   ;;  %s1072_s6 = smov (%p841_p12, %s37_s6), 0 }
  0x31   : > { %488 = dma.vmem_to_smem (!%p836_p11), %s191_s30, 16, %s741_s8, [#allocation6]  }
  0x32   : > { %s88_s9 = sadd.s32 1, %s726_s17  ;;  %p95_p1 = scmp.ne.s32.totalorder %s726_s17, %s722_s16 }
  0x33   : > { %s83_s5 = ssub.s32 %s734_s19, %s1072_s6  ;;  %p96_p4 = scmp.eq.s32.totalorder %s738_s20, 0 }
  0x34   : > { %p86_p6 = scmp.eq.s32.totalorder %s83_s5, 0  ;;  %p875_p8 = por %p808_p2, %p95_p1 }
  0x35   : > { %p97_p9 = por %p96_p4, %p95_p1  ;;  %p502_p0 = scmp.lt.s32.totalorder %s738_s20, 2 }
  0x36   : > { %s1057_s10 = scalar_select %p875_p8, 1, 0 }
  0x37   : > { %s881_s11 = scalar_select %p86_p6, %s726_s17, %s88_s9  }
  0x38   : > { %s884_s12 = sand.u32 1, %s726_s17   ;;  %s455_s30 = sshll.u32 %s734_s19, 7 }
  0x39   : > { %s1046_s7 = sshll.u32 %s884_s12, 3  ;;  %s893_s24 = scalar_lea.hbm %s1039_s2, %s455_s30 }
  0x3a   : > { %s205_s21 = scalar_lea.vmem [#allocation8], %s1046_s7  ;;  %p897_p2 = pnand %p502_p0, %p97_p9 }
  0x3b   : > { %s213_s22 = sshll.u32 %s205_s21, 4  ;;  %s202_s29 = scalar_lea.sflag [#allocation3], %s884_s12  ;;  %s901_s22 = int_to_ptr.vmem [resolvable:$true] %s213_s22 }
  0x3c   : > { %s584_s8 = scalar_lea.hbm %s893_s24, 128  ;;  %p586_p12 = pneg %p897_p2 }
  0x3d   : > { %p585_p11 = scmp.ne.s32.totalorder %s893_s24, %s584_s8  ;;  %s589_s13 = scalar_lea.hbm %s1039_s2, 256 }
  0x3e   : > { %p590_p10 = scmp.lt.u32.totalorder %s893_s24, %s1039_s2  ;;  %p591_p13 = scmp.lt.u32.totalorder %s589_s13, %s584_s8 }
  0x3f   : > { %p587_p5 = pnand %p586_p12, %p585_p11  ;;  %p593_p1 = scmp.lt.u32.totalorder %s584_s8, %s893_s24 }
  0x40   : > { %p592_p3 = por %p591_p13, %p590_p10 }
  0x41   : > { %p588_p7 = pneg %p587_p5 }
  0x42   : > { %p594_p4 = por %p593_p1, %p592_p3 }
  0x44   : > { %p595_p6 = pnand %p594_p4, %p588_p7 }
  0x46   : > { %598 = shalt.err (!%p595_p6)
}
  0x47   : > { %s599_s7 = scalar_lea.vmem %s901_s22, 128  ;;  %s742_s9 = smov [#allocation8]  }
  0x48   : > { %p600_p9 = scmp.ne.s32.totalorder %s901_s22, %s599_s7  ;;  %s604_s5 = sshll.u32 %s742_s9, 4  ;;  %s605_s5 = int_to_ptr.vmem [resolvable:$false] %s604_s5 }
  0x49   : > { %s606_s14 = scalar_lea.vmem %s605_s5, 256  ;;  %p607_p5 = scmp.lt.s32.totalorder %s901_s22, %s605_s5 }
  0x4a   : > { %p602_p0 = pnand %p600_p9, %p586_p12  ;;  %p608_p10 = scmp.lt.s32.totalorder %s606_s14, %s599_s7 }
  0x4c   : > { %p603_p11 = pneg %p602_p0  ;;  %p609_p13 = por %p608_p10, %p607_p5 }
  0x4e   : > { %p610_p3 = pnand %p609_p13, %p603_p11 }
  0x50   : > { %613 = shalt.err (!%p610_p3)
}
  0x51   : > { %492 = dma.hbm_to_vmem [thread:$0]  (!%p897_p2), %s893_s24, 128, %s901_s22, %s202_s29  }
  0x52   : > { %s934_s21 = scalar_lea.hbm %s1040_s3, %s455_s30  ;;  %s1059_s9 = sshll.u32 %s884_s12, 3 }
  0x53   : > { %s224_s7 = scalar_lea.vmem [#allocation9], %s1059_s9  ;;  %s221_s14 = scalar_lea.sflag [#allocation10], %s884_s12 }
  0x54   : > { %s232_s5 = sshll.u32 %s224_s7, 4  ;;  %s614_s0 = scalar_lea.hbm %s934_s21, 128  ;;  %s233_s5 = int_to_ptr.vmem [resolvable:$true] %s232_s5 }
  0x55   : > { %p615_p7 = scmp.ne.s32.totalorder %s934_s21, %s614_s0  ;;  %s619_s30 = scalar_lea.hbm %s1040_s3, 256 }
  0x56   : > { %p620_p6 = scmp.lt.u32.totalorder %s934_s21, %s1040_s3  ;;  %p621_p9 = scmp.lt.u32.totalorder %s619_s30, %s614_s0 }
  0x57   : > { %p617_p1 = pnand %p615_p7, %p586_p12  ;;  %p623_p11 = scmp.lt.u32.totalorder %s614_s0, %s934_s21 }
  0x58   : > { %p622_p0 = por %p621_p9, %p620_p6 }
  0x59   : > { %p618_p4 = pneg %p617_p1 }
  0x5a   : > { %p624_p5 = por %p623_p11, %p622_p0 }
  0x5c   : > { %p625_p10 = pnand %p624_p5, %p618_p4 }
  0x5e   : > { %628 = shalt.err (!%p625_p10)
}
  0x5f   : > { %s629_s12 = scalar_lea.vmem %s233_s5, 128  ;;  %s743_s13 = smov [#allocation9]  }
  0x60   : > { %p630_p13 = scmp.ne.s32.totalorder %s233_s5, %s629_s12  ;;  %s634_s9 = sshll.u32 %s743_s13, 4  ;;  %s635_s9 = int_to_ptr.vmem [resolvable:$false] %s634_s9 }
  0x61   : > { %s636_s7 = scalar_lea.vmem %s635_s9, 256  ;;  %p637_p1 = scmp.lt.s32.totalorder %s233_s5, %s635_s9 }
  0x62   : > { %p632_p3 = pnand %p630_p13, %p586_p12  ;;  %p638_p8 = scmp.lt.s32.totalorder %s636_s7, %s629_s12 }
  0x64   : > { %p633_p7 = pneg %p632_p3  ;;  %p639_p6 = por %p638_p8, %p637_p1 }
  0x66   : > { %p640_p9 = pnand %p639_p6, %p633_p7 }
  0x68   : > { %643 = shalt.err (!%p640_p9)
}
  0x69   : > { %495 = dma.hbm_to_vmem [thread:$0]  (!%p897_p2), %s934_s21, 128, %s233_s5, %s221_s14  }
  0x6a   : > { %p1060_p4 = scmp.ne.s32.totalorder %s1053_s27, 0 }
  0x6b   : > { %p1061_p0 = scmp.ne.s32.totalorder (!%p1060_p4), %s1049_s23, 0 }
  0x6c   : > { %241 = sbr.rel (%p1060_p4) target bundleno = 153 (0x99), region = 36 }
  0x73   : > { %697 = dma.done.wait (%p1061_p0), [#allocation5], 16  }
  0x74   : > { %699 = vsyncadd (%p1061_p0), [#allocation5], 4294967280 }
  0x75   : > { %701 = dma.done.wait (%p1061_p0), [#allocation6], 16  }
  0x76   : > { %703 = vsyncadd (%p1061_p0), [#allocation6], 4294967280  ;;  %s969_s0 = sand.u32 1, %s722_s16   ;;  %p1062_p8 = scmp.ne.s32.totalorder %s1051_s25, 0 }
  0x77   : > { %s461_s27 = sshll.u32 %s969_s0, 3  ;;  %s252_s28 = scalar_lea.sflag [#allocation3], %s969_s0 }
  0x78   : > { %s255_s21 = scalar_lea.vmem [#allocation8], %s461_s27 }
  0x79   : > { %705 = dma.done.wait (%p1062_p8), %s252_s28, 128  }
  0x7a   : > { %707 = vsyncadd (%p1062_p8), %s252_s28, 4294967168  ;;  %s261_s5 = scalar_lea.sflag [#allocation10], %s969_s0  ;;  %s264_s14 = scalar_lea.vmem [#allocation9], %s461_s27 }
  0x7b   : > { %709 = dma.done.wait (%p1062_p8), %s261_s5, 128  }
  0x7c   : > { %711 = vsyncadd (%p1062_p8), %s261_s5, 4294967168 }
  0x7d   : > { %269 = sfence }
  0x7e   : > { %s295_s23 = sld [smem:[#allocation2 + %s730_s18]]  ;;  %v297_v0 = vld [vmem:[%s255_s21] sm:$0xff]  ;;  %v300_v1 = vld [vmem:[%s264_s14] sm:$0xff]  ;;  %s294_s22 = scalar_lea.vmem [#allocation11], %s461_s27 }
  0x7f   : > { %s296_s24 = sld [smem:[#allocation7 + %s730_s18]]  ;;  %s320_s30 = sshll.u32 %s294_s22, 4  ;;  %s985_s30 = int_to_ptr.vmem [resolvable:$true] %s320_s30 }
  0x80   : > { %s465_s29 = sshll.u32 %s730_s18, 7  ;;  %s306_s13 = scalar_lea.sflag [#allocation4], %s969_s0 }
  0x81   : > { %s990_s12 = scalar_lea.hbm %s1041_s4, %s465_s29  ;;  %s644_s9 = scalar_lea.vmem %s985_s30, 128 }
  0x82   : > { %p645_p2 = scmp.ne.s32.totalorder %s985_s30, %s644_s9  ;;  %p1063_p12 = scmp.ne.s32.totalorder %s1057_s10, 0 }
  0x83   : > { %s744_s18 = smov [#allocation11]  }
  0x84   : > { %v298_v2 = vstv %s295_s23  ;;  %p646_p11 = pnand %p645_p2, %p1063_p12  ;;  %s648_s7 = sshll.u32 %s744_s18, 4  ;;  %s649_s7 = int_to_ptr.vmem [resolvable:$false] %s648_s7 }
  0x85   : > { %v299_v3 = vmul.f32 %v298_v2, %v297_v0  ;;  %v301_v4 = vstv %s296_s24  ;;  %s650_s27 = scalar_lea.vmem %s649_s7, 256  ;;  %p651_p10 = scmp.lt.s32.totalorder %s985_s30, %s649_s7 }
  0x86   : > { %v302_v5 = vmul.f32 %v301_v4, %v300_v1  ;;  %p647_p5 = pneg %p646_p11  ;;  %p652_p13 = scmp.lt.s32.totalorder %s650_s27, %s644_s9 }
  0x88   : > { %v303_v6 = vadd.f32 %v302_v5, %v299_v3  ;;  %p653_p3 = por %p652_p13, %p651_p10 }
  0x8a   : > { %304 = vst [vmem:[%s294_s22] sm:$0xff] %v303_v6  ;;  %p654_p7 = pnand %p653_p3, %p647_p5 }
  0x8c   : > { %657 = shalt.err (!%p654_p7)
}
  0x8d   : > { %s658_s0 = scalar_lea.hbm %s990_s12, 128  ;;  %s662_s5 = scalar_lea.hbm %s1041_s4, 256 }
  0x8e   : > { %p659_p1 = scmp.ne.s32.totalorder %s990_s12, %s658_s0  ;;  %p663_p4 = scmp.lt.u32.totalorder %s990_s12, %s1041_s4 }
  0x8f   : > { %p664_p0 = scmp.lt.u32.totalorder %s662_s5, %s658_s0  ;;  %p666_p2 = scmp.lt.u32.totalorder %s658_s0, %s990_s12 }
  0x90   : > { %p660_p6 = pnand %p659_p1, %p1063_p12 }
  0x91   : > { %p665_p8 = por %p664_p0, %p663_p4 }
  0x92   : > { %p661_p9 = pneg %p660_p6 }
  0x93   : > { %p667_p11 = por %p666_p2, %p665_p8 }
  0x95   : > { %p668_p5 = pnand %p667_p11, %p661_p9 }
  0x97   : > { %671 = shalt.err (!%p668_p5)
}
  0x98   : > { %480 = dma.vmem_to_hbm [thread:$0]  (%p1063_p12), %s985_s30, 128, %s990_s12, %s306_s13  }
  0x99 PF: > { %s332_s24 = sand.u32 1, %s718_s15   ;;  %p1064_p10 = scmp.ne.s32.totalorder %s1052_s26, 0 }
  0x9a   : > { %p1065_p13 = scmp.ge.s32.totalorder %s738_s20, 2  ;;  %s333_s22 = scalar_lea.sflag [#allocation4], %s332_s24 }
  0x9c   : > { %p497_p3 = pnand %p1065_p13, %p1064_p10 }
  0x9e   : > { %713 = dma.done.wait (!%p497_p3), %s333_s22, 128  }
  0x9f   : > { %715 = vsyncadd (!%p497_p3), %s333_s22, 4294967168  ;;  %s25_s20 = sadd.s32 1, %s738_s20   ;;  %s1066_s15 = smov %s722_s16 }
  0xa0   : > { %p22_p7 = scmp.ge.s32.totalorder %s25_s20, 4   ;;  %s1067_s16 = smov %s726_s17 }
  0xa1   : > { %s1068_s17 = smov %s881_s11  ;;  %s1069_s18 = smov %s734_s19 }
  0xa2   : > { %s1070_s19 = smov %s1072_s6  ;;  %24 = sbr.rel (!%p22_p7) target bundleno = 12 (0xc), region = 104 }
  0xa9   :  { %338 = vsyncpa [#allocation3], 1 }
  0xaa   :  { %340 = vsyncpa [#allocation3 + $0x1], 1 }
  0xab   :  { %341 = vsyncpa [#allocation10], 1 }
  0xac   :  { %343 = vsyncpa [#allocation10 + $0x1], 1 }
  0xad   :  { %344 = vsyncpa [#allocation4], 1 }
  0xae   :  { %346 = vsyncpa [#allocation4 + $0x1], 1 }
  0xaf   :  { %347 = vsyncpa [#allocation5], 1 }
  0xb0   :  { %349 = vsyncpa [#allocation5 + $0x1], 1 }
  0xb1   :  { %350 = vsyncpa [#allocation6], 1 }
  0xb2   :  { %352 = vsyncpa [#allocation6 + $0x1], 1 }

</bundles_post_ra>
